<compile_context>
chip_gen: v6e
topology: v6e:2x2x1
jax: 0.10.0
libtpu: 0.0.40
codegen_flags: <defaults>
</compile_context>

<pallas_src>
import functools

import jax
import jax.numpy as jnp
from jax import lax
from jax.experimental import pallas as pl
from jax.experimental.pallas import tpu as pltpu

EPS = 1e-5


def _round_up(x, m):
    return ((x + m - 1) // m) * m


def _vmem_capacity_bytes():
    try:
        return int(pltpu.get_tpu_info().vmem_capacity_bytes)
    except Exception:
        return 128 * 2**20          # v5e/v6e default if the query is unavailable


def _plan(M, in_f, hidden_pad, out_pad, x_bytes, out_bytes, vmem_cap):
    """Pick (row tile, contraction tile, contraction grid, vmem limit)."""
    ncat = hidden_pad + out_pad
    budget = (vmem_cap * 3) // 4                      # ~25% headroom below physical VMEM
    tm_max = 256 if vmem_cap <= (64 << 20) else 512   # v7x (64 MiB) vs v5e/v6e (128 MiB)

    # Row tile: as large as possible, but keep >=2 grid steps for medium M so both
    # TensorCores (v7x) get work on the "parallel" axis.
    if M > 2 * tm_max:
        tm = tm_max
    else:
        tm = max(8, min(tm_max, _round_up((M + 1) // 2, 8)))

    def working_set(tm_, tk_, grid_k_):
        wcat_bufs = 1 if grid_k_ == 1 else 2
        return (2 * tm_ * tk_ * x_bytes                    # x tile (double-buffered)
                + wcat_bufs * tk_ * ncat * 2               # [W1 | Wfx] bf16
                + hidden_pad * out_pad * 2                 # Wfm bf16 (single buffer)
                + (3 * hidden_pad + out_pad) * 4           # packed params + fc bias
                + 2 * tm_ * out_pad * out_bytes            # output tile (double-buffered)
                + tm_ * ncat * 4                           # f32 accumulator scratch
                + tm_ * hidden_pad * 10                    # y(f32)+act(f32)+act(bf16) temps
                + tm_ * out_pad * 4)                       # f32 epilogue temp

    while True:
        # Contraction split only when in_f is 128-aligned (lane-tile aligned slices,
        # exact division so no garbage accumulates along K).
        tk = in_f
        if in_f % 128 == 0:
            while (tk > 128 and tk % 256 == 0
                   and working_set(tm, tk, in_f // tk) > budget):
                tk //= 2
        grid_k = in_f // tk
        ws = working_set(tm, tk, grid_k)
        if ws <= budget or tm <= 64:
            break
        tm = max(64, _round_up(tm // 2, 8))

    vmem_limit = int(min(budget, max(32 << 20, ws + ws // 4 + (2 << 20))))
    return tm, tk, grid_k, vmem_limit


def decoder_rescat_kernel(x_ref, wcat_ref, wfm_ref, p_ref, bf_ref, o_ref, acc_ref,
                          *, hidden, hidden_pad):
    """Fused Linear -> LayerNorm -> ReLU -> (residual-concat) Linear for one row tile.

    Grid = (row tiles, contraction tiles). z = x @ [W1 | Wfx] accumulates into the f32
    VMEM scratch; the epilogue on the last contraction step does LN/ReLU + second matmul.
    """
    k = pl.program_id(1)

    @pl.when(k == 0)
    def _():
        acc_ref[...] = jnp.zeros_like(acc_ref)

    # bf16 MXU operands with f32 accumulation; cast in-kernel so the wrapper never
    # materializes a padded / downcast copy of x in HBM.
    xb = x_ref[...].astype(jnp.bfloat16)
    acc_ref[...] += jnp.dot(xb, wcat_ref[...], preferred_element_type=jnp.float32)

    @pl.when(k == pl.num_programs(1) - 1)
    def _():
        z = acc_ref[...]                              # (tm, hidden_pad + out_pad) f32
        b1 = p_ref[0:1, :]
        gamma = p_ref[1:2, :]
        beta = p_ref[2:3, :]

        y = z[:, :hidden_pad] + b1                    # (tm, hidden_pad) f32

        # LayerNorm over the *real* hidden features: padded W1 columns / b1 entries are
        # exactly zero, so sum/sumsq over hidden_pad equal those over hidden.
        inv_h = 1.0 / float(hidden)
        row_sum = jnp.sum(y, axis=-1, keepdims=True)
        row_sumsq = jnp.sum(y * y, axis=-1, keepdims=True)
        mean = row_sum * inv_h
        var = jnp.maximum(row_sumsq * inv_h - mean * mean, 0.0)   # clamp: no NaN in rsqrt
        inv_std = lax.rsqrt(var + EPS)                            # EUP
        act = jnp.maximum(gamma * (y - mean) * inv_std + beta, 0.0)   # ReLU

        out = z[:, hidden_pad:]                       # x @ Wfx partial
        out = out + jnp.dot(act.astype(wfm_ref.dtype), wfm_ref[...],
                            preferred_element_type=jnp.float32)
        out = out + bf_ref[...]
        o_ref[...] = out.astype(o_ref.dtype)


def decoder_rescat_forward(x, wcat, wfm_t, params, bf, *, hidden, hidden_pad,
                           out_dtype=jnp.float32):
    """x: (M, in_f). wcat: (in_f, hidden_pad+out_pad) bf16. Returns (M, out_pad)."""
    M, in_f = x.shape
    ncat = wcat.shape[1]
    out_pad = wfm_t.shape[1]

    vmem_cap = _vmem_capacity_bytes()
    tm, tk, grid_k, vmem_limit = _plan(M, in_f, hidden_pad, out_pad,
                                       x.dtype.itemsize,
                                       jnp.dtype(out_dtype).itemsize,
                                       vmem_cap)
    grid_m = pl.cdiv(M, tm)          # ragged last row block handled by Pallas (row-local)

    const = dict(pipeline_mode=pl.Buffered(1))   # fetched once -> single VMEM buffer
    if grid_k == 1:
        wcat_spec = pl.BlockSpec((in_f, ncat), lambda i, k: (0, 0), **const)
    else:
        wcat_spec = pl.BlockSpec((tk, ncat), lambda i, k: (k, 0))   # changes with k

    kernel = functools.partial(decoder_rescat_kernel,
                               hidden=hidden, hidden_pad=hidden_pad)

    out = pl.pallas_call(
        kernel,
        out_shape=jax.ShapeDtypeStruct((M, out_pad), out_dtype),
        grid_spec=pltpu.PrefetchScalarGridSpec(
            num_scalar_prefetch=0,
            grid=(grid_m, grid_k),
            in_specs=[
                pl.BlockSpec((tm, tk), lambda i, k: (i, k)),                    # x rows / K slice
                wcat_spec,                                                      # [W1^T | Wfx^T]
                pl.BlockSpec((hidden_pad, out_pad), lambda i, k: (0, 0), **const),  # Wfm^T
                pl.BlockSpec((3, hidden_pad), lambda i, k: (0, 0), **const),    # b1/gamma/beta
                pl.BlockSpec((1, out_pad), lambda i, k: (0, 0), **const),       # fc bias
            ],
            out_specs=pl.BlockSpec((tm, out_pad), lambda i, k: (i, 0)),
            scratch_shapes=[pltpu.VMEM((tm, ncat), jnp.float32)],
        ),
        compiler_params=pltpu.CompilerParams(
            dimension_semantics=("parallel", "arbitrary"),
            vmem_limit_bytes=vmem_limit),
    )(x, wcat, wfm_t, params, bf)
    return out


class DecoderResCatPallas:
    """Pallas equivalent of DecoderResCat: fc(cat([x, relu(LN(linear(x)))], -1))."""

    def __init__(self, hidden_size, in_features, out_features=60, key=None):
        if key is None:
            key = jax.random.PRNGKey(0)
        k1, k2, k3, k4 = jax.random.split(key, 4)

        # MLP linear: in_features -> hidden_size (nn.Linear default init)
        b1_bound = 1.0 / (in_features ** 0.5)
        w1 = jax.random.uniform(k1, (hidden_size, in_features), jnp.float32,
                                -b1_bound, b1_bound)
        b1 = jax.random.uniform(k2, (hidden_size,), jnp.float32, -b1_bound, b1_bound)

        # fc: (in_features + hidden_size) -> out_features
        cat = in_features + hidden_size
        f_bound = 1.0 / (cat ** 0.5)
        wf = jax.random.uniform(k3, (out_features, cat), jnp.float32, -f_bound, f_bound)
        bfv = jax.random.uniform(k4, (out_features,), jnp.float32, -f_bound, f_bound)

        hidden_pad = _round_up(hidden_size, 128)     # 128-aligned lane split of z
        out_pad = _round_up(out_features, 128)       # lane-dense output stores

        # --- fused / padded MXU weights (bf16), epilogue params (f32) ---
        # W1^T padded with zero columns (so LN sums are unchanged); fc weight split along
        # the concat axis: cols [:in] hit x, cols [in:] hit mlp(x); Wfm padded rows are
        # zero so padded activations contribute nothing.
        w1_t = jnp.zeros((in_features, hidden_pad), jnp.float32
                         ).at[:, :hidden_size].set(w1.T)
        wfx_t = jnp.zeros((in_features, out_pad), jnp.float32
                          ).at[:, :out_features].set(wf[:, :in_features].T)
        wfm_t = jnp.zeros((hidden_pad, out_pad), jnp.float32
                          ).at[:hidden_size, :out_features].set(wf[:, in_features:].T)

        # Single [W1^T | Wfx^T] weight -> one MXU pass over x per row tile.
        self.wcat = jnp.concatenate([w1_t, wfx_t], axis=1).astype(jnp.bfloat16)
        self.wfm_t = wfm_t.astype(jnp.bfloat16)

        # b1 / gamma / beta packed into one (3, hidden_pad) f32 block; padded gamma/beta
        # are zero so padded activations stay exactly zero after LN+ReLU.
        params = jnp.zeros((3, hidden_pad), jnp.float32)
        params = params.at[0, :hidden_size].set(b1)      # b1
        params = params.at[1, :hidden_size].set(1.0)     # LN weight (ones)
        # row 2 (LN bias) stays zero
        self.params = params
        self.bf = jnp.zeros((1, out_pad), jnp.float32).at[0, :out_features].set(bfv)

        self.in_features = in_features
        self.hidden_size = hidden_size
        self.hidden_pad = hidden_pad
        self.out_features = out_features
        self.out_pad = out_pad

    def __call__(self, hidden_states, out_dtype=jnp.float32):
        # out_dtype=jnp.bfloat16 halves the output HBM writeback if downstream tolerates it.
        lead = hidden_states.shape[:-1]
        x2d = hidden_states.reshape(-1, self.in_features)
        y2d = decoder_rescat_forward(x2d, self.wcat, self.wfm_t, self.params, self.bf,
                                     hidden=self.hidden_size, hidden_pad=self.hidden_pad,
                                     out_dtype=out_dtype)
        return y2d[:, :self.out_features].reshape(*lead, self.out_features)


def _reference(x2d, mod):
    """Plain-JAX reference emulating the kernel's bf16 operands / f32 accumulation."""
    # NOTE: x is downcast to bf16 for the MXU (documented accuracy decision vs f32 PyTorch).
    xb = x2d.astype(jnp.bfloat16)
    h, hp = mod.hidden_size, mod.hidden_pad
    w1_t = mod.wcat[:, :h]
    wfx_t = mod.wcat[:, hp:]
    y = jnp.dot(xb, w1_t, preferred_element_type=jnp.float32) + mod.params[0:1, :h]
    u = jnp.mean(y, axis=-1, keepdims=True)
    s = jnp.mean((y - u) ** 2, axis=-1, keepdims=True)
    yn = (y - u) / jnp.sqrt(s + EPS)
    act = jnp.maximum(mod.params[1:2, :h] * yn + mod.params[2:3, :h], 0.0)
    out = (jnp.dot(xb, wfx_t, preferred_element_type=jnp.float32)
           + jnp.dot(act.astype(jnp.bfloat16), mod.wfm_t[:h, :],
                     preferred_element_type=jnp.float32)
           + mod.bf)
    return out[:, :mod.out_features]


if __name__ == "__main__":
    key = jax.random.PRNGKey(0)
    kx, kp = jax.random.split(key)

    batch, seq = 2, 8
    in_features, hidden_size, out_features = 32, 64, 60
    mod = DecoderResCatPallas(hidden_size=hidden_size, in_features=in_features,
                              out_features=out_features, key=kp)

    x = jax.random.normal(kx, (batch, seq, in_features), jnp.float32)

    out = mod(x)
    out = jax.block_until_ready(out)
    assert out.shape == (batch, seq, out_features)

    ref = _reference(x.reshape(-1, in_features), mod).reshape(batch, seq, out_features)
    err = float(jnp.max(jnp.abs(out - ref)))
    assert jnp.allclose(out, ref, atol=1e-2, rtol=1e-2), f"max abs err {err}"

    print("KERNEL_OK")
</pallas_src>

<mosaic_0001>
module attributes {stable_mosaic.version = 11 : i64} {
  func.func @decoder_rescat_kernel(%arg0: i32, %arg1: i32, %arg2: memref<8x32xf32, #tpu.memory_space<vmem>>, %arg3: memref<32x256xbf16, #tpu.memory_space<vmem>>, %arg4: memref<128x128xbf16, #tpu.memory_space<vmem>>, %arg5: memref<3x128xf32, #tpu.memory_space<vmem>>, %arg6: memref<1x128xf32, #tpu.memory_space<vmem>>, %arg7: memref<8x128xf32, #tpu.memory_space<vmem>>, %arg8: memref<8x256xf32, #tpu.memory_space<vmem>>) attributes {dimension_semantics = [#tpu.dimension_semantics<parallel>, #tpu.dimension_semantics<arbitrary>], iteration_bounds = array<i64: 2, 1>, scalar_prefetch = 0 : i64, scratch_operands = 1 : i64, tpu.core_type = #tpu.core_type<tc>, window_params = [{transform_indices = @transform_0, window_bounds = array<i64: 8, 32>}, {pipeline_mode = #tpu.pipeline_mode<synchronous>, transform_indices = @transform_1, window_bounds = array<i64: 32, 256>}, {pipeline_mode = #tpu.pipeline_mode<synchronous>, transform_indices = @transform_2, window_bounds = array<i64: 128, 128>}, {pipeline_mode = #tpu.pipeline_mode<synchronous>, transform_indices = @transform_3, window_bounds = array<i64: 3, 128>}, {pipeline_mode = #tpu.pipeline_mode<synchronous>, transform_indices = @transform_4, window_bounds = array<i64: 1, 128>}, {transform_indices = @transform_5, window_bounds = array<i64: 8, 128>}]} {
    %c0_i32 = arith.constant 0 : i32
    %0 = arith.cmpi eq, %arg1, %c0_i32 : i32
    %1 = arith.extui %0 : i1 to i32
    %c0_i32_0 = arith.constant 0 : i32
    %2 = arith.cmpi ne, %1, %c0_i32_0 : i32
    scf.if %2 {
      %cst_10 = arith.constant 0.000000e+00 : f32
      %13 = vector.broadcast %cst_10 : f32 to vector<8x256xf32>
      %c0_11 = arith.constant 0 : index
      %c0_12 = arith.constant 0 : index
      %14 = vector.load %arg8[%c0_11, %c0_12] : memref<8x256xf32, #tpu.memory_space<vmem>>, vector<8x256xf32>
      tpu.vector_store %arg8[%c0_11, %c0_12], %13 {strides = array<i32>} : memref<8x256xf32, #tpu.memory_space<vmem>>, vector<8x256xf32>,
    } else {
    }
    %c0 = arith.constant 0 : index
    %c0_1 = arith.constant 0 : index
    %3 = vector.load %arg2[%c0, %c0_1] : memref<8x32xf32, #tpu.memory_space<vmem>>, vector<8x32xf32>
    %4 = arith.truncf %3 : vector<8x32xf32> to vector<8x32xbf16>
    %c0_2 = arith.constant 0 : index
    %c0_3 = arith.constant 0 : index
    %5 = vector.load %arg8[%c0_2, %c0_3] : memref<8x256xf32, #tpu.memory_space<vmem>>, vector<8x256xf32>
    %c0_4 = arith.constant 0 : index
    %c0_5 = arith.constant 0 : index
    %6 = vector.load %arg3[%c0_4, %c0_5] : memref<32x256xbf16, #tpu.memory_space<vmem>>, vector<32x256xbf16>
    %cst = arith.constant dense<0.000000e+00> : vector<8x256xf32>
    %7 = tpu.matmul %4, %6, %cst {dimension_numbers = #tpu.dot_dimension_numbers<[1], [0], [0], [1], [0, 0, 1, 1], [], []>} : vector<8x32xbf16>, vector<32x256xbf16>, vector<8x256xf32> -> vector<8x256xf32>
    %8 = arith.addf %5, %7 : vector<8x256xf32>
    %c0_6 = arith.constant 0 : index
    %c0_7 = arith.constant 0 : index
    %9 = vector.load %arg8[%c0_6, %c0_7] : memref<8x256xf32, #tpu.memory_space<vmem>>, vector<8x256xf32>
    tpu.vector_store %arg8[%c0_6, %c0_7], %8 {strides = array<i32>} : memref<8x256xf32, #tpu.memory_space<vmem>>, vector<8x256xf32>,
    %c0_i32_8 = arith.constant 0 : i32
    %10 = arith.cmpi eq, %arg1, %c0_i32_8 : i32
    %11 = arith.extui %10 : i1 to i32
    %c0_i32_9 = arith.constant 0 : i32
    %12 = arith.cmpi ne, %11, %c0_i32_9 : i32
    scf.if %12 {
      %c0_10 = arith.constant 0 : index
      %c0_11 = arith.constant 0 : index
      %13 = vector.load %arg8[%c0_10, %c0_11] : memref<8x256xf32, #tpu.memory_space<vmem>>, vector<8x256xf32>
      %c0_12 = arith.constant 0 : index
      %c0_13 = arith.constant 0 : index
      %14 = vector.load %arg5[%c0_12, %c0_13] : memref<3x128xf32, #tpu.memory_space<vmem>>, vector<1x128xf32>
      %c1 = arith.constant 1 : index
      %c0_14 = arith.constant 0 : index
      %15 = vector.load %arg5[%c1, %c0_14] : memref<3x128xf32, #tpu.memory_space<vmem>>, vector<1x128xf32>
      %c2 = arith.constant 2 : index
      %c0_15 = arith.constant 0 : index
      %16 = vector.load %arg5[%c2, %c0_15] : memref<3x128xf32, #tpu.memory_space<vmem>>, vector<1x128xf32>
      %17 = vector.extract_strided_slice %13 {offsets = [0, 0], sizes = [8, 128], strides = [1, 1]} : vector<8x256xf32> to vector<8x128xf32>
      %18 = vector.broadcast %14 : vector<1x128xf32> to vector<8x128xf32>
      %19 = arith.addf %17, %18 : vector<8x128xf32>
      %cst_16 = arith.constant dense<0.000000e+00> : vector<8xf32>
      %20 = vector.multi_reduction <add>, %19, %cst_16 [1] : vector<8x128xf32> to vector<8xf32>
      %21 = vector.shape_cast %20 : vector<8xf32> to vector<8x1xf32>
      %22 = arith.mulf %19, %19 : vector<8x128xf32>
      %cst_17 = arith.constant dense<0.000000e+00> : vector<8xf32>
      %23 = vector.multi_reduction <add>, %22, %cst_17 [1] : vector<8x128xf32> to vector<8xf32>
      %24 = vector.shape_cast %23 : vector<8xf32> to vector<8x1xf32>
      %cst_18 = arith.constant 1.562500e-02 : f32
      %25 = vector.broadcast %cst_18 : f32 to vector<8x1xf32>
      %26 = arith.mulf %21, %25 : vector<8x1xf32>
      %cst_19 = arith.constant 1.562500e-02 : f32
      %27 = vector.broadcast %cst_19 : f32 to vector<8x1xf32>
      %28 = arith.mulf %24, %27 : vector<8x1xf32>
      %29 = arith.mulf %26, %26 : vector<8x1xf32>
      %30 = arith.subf %28, %29 : vector<8x1xf32>
      %cst_20 = arith.constant 0.000000e+00 : f32
      %31 = vector.broadcast %cst_20 : f32 to vector<8x1xf32>
      %32 = arith.maximumf %30, %31 : vector<8x1xf32>
      %cst_21 = arith.constant 9.99999974E-6 : f32
      %33 = vector.broadcast %cst_21 : f32 to vector<8x1xf32>
      %34 = arith.addf %32, %33 : vector<8x1xf32>
      %35 = math.rsqrt %34 : vector<8x1xf32>
      %36 = vector.broadcast %26 : vector<8x1xf32> to vector<8x128xf32>
      %37 = arith.subf %19, %36 : vector<8x128xf32>
      %38 = vector.broadcast %15 : vector<1x128xf32> to vector<8x128xf32>
      %39 = arith.mulf %38, %37 : vector<8x128xf32>
      %40 = vector.broadcast %35 : vector<8x1xf32> to vector<8x128xf32>
      %41 = arith.mulf %39, %40 : vector<8x128xf32>
      %42 = vector.broadcast %16 : vector<1x128xf32> to vector<8x128xf32>
      %43 = arith.addf %41, %42 : vector<8x128xf32>
      %cst_22 = arith.constant 0.000000e+00 : f32
      %44 = vector.broadcast %cst_22 : f32 to vector<8x128xf32>
      %45 = arith.maximumf %43, %44 : vector<8x128xf32>
      %46 = vector.extract_strided_slice %13 {offsets = [0, 128], sizes = [8, 128], strides = [1, 1]} : vector<8x256xf32> to vector<8x128xf32>
      %47 = arith.truncf %45 : vector<8x128xf32> to vector<8x128xbf16>
      %c0_23 = arith.constant 0 : index
      %c0_24 = arith.constant 0 : index
      %48 = vector.load %arg4[%c0_23, %c0_24] : memref<128x128xbf16, #tpu.memory_space<vmem>>, vector<128x128xbf16>
      %cst_25 = arith.constant dense<0.000000e+00> : vector<8x128xf32>
      %49 = tpu.matmul %47, %48, %cst_25 {dimension_numbers = #tpu.dot_dimension_numbers<[1], [0], [0], [1], [0, 0, 1, 1], [], []>} : vector<8x128xbf16>, vector<128x128xbf16>, vector<8x128xf32> -> vector<8x128xf32>
      %50 = arith.addf %46, %49 : vector<8x128xf32>
      %c0_26 = arith.constant 0 : index
      %c0_27 = arith.constant 0 : index
      %51 = vector.load %arg6[%c0_26, %c0_27] : memref<1x128xf32, #tpu.memory_space<vmem>>, vector<1x128xf32>
      %52 = vector.broadcast %51 : vector<1x128xf32> to vector<8x128xf32>
      %53 = arith.addf %50, %52 : vector<8x128xf32>
      %c0_28 = arith.constant 0 : index
      %c0_29 = arith.constant 0 : index
      %54 = vector.load %arg7[%c0_28, %c0_29] : memref<8x128xf32, #tpu.memory_space<vmem>>, vector<8x128xf32>
      tpu.vector_store %arg7[%c0_28, %c0_29], %53 {strides = array<i32>} : memref<8x128xf32, #tpu.memory_space<vmem>>, vector<8x128xf32>,
    } else {
    }
    return
  }
  func.func @transform_0(%arg0: i32, %arg1: i32) -> (i32, i32) {
    %c0_i32 = arith.constant 0 : i32
    return %arg0, %arg1 : i32, i32
  }
  func.func @transform_1(%arg0: i32, %arg1: i32) -> (i32, i32) {
    %c0_i32 = arith.constant 0 : i32
    %c0_i32_0 = arith.constant 0 : i32
    %c0_i32_1 = arith.constant 0 : i32
    return %c0_i32, %c0_i32_0 : i32, i32
  }
  func.func @transform_2(%arg0: i32, %arg1: i32) -> (i32, i32) {
    %c0_i32 = arith.constant 0 : i32
    %c0_i32_0 = arith.constant 0 : i32
    %c0_i32_1 = arith.constant 0 : i32
    return %c0_i32, %c0_i32_0 : i32, i32
  }
  func.func @transform_3(%arg0: i32, %arg1: i32) -> (i32, i32) {
    %c0_i32 = arith.constant 0 : i32
    %c0_i32_0 = arith.constant 0 : i32
    %c0_i32_1 = arith.constant 0 : i32
    return %c0_i32, %c0_i32_0 : i32, i32
  }
  func.func @transform_4(%arg0: i32, %arg1: i32) -> (i32, i32) {
    %c0_i32 = arith.constant 0 : i32
    %c0_i32_0 = arith.constant 0 : i32
    %c0_i32_1 = arith.constant 0 : i32
    return %c0_i32, %c0_i32_0 : i32, i32
  }
  func.func @transform_5(%arg0: i32, %arg1: i32) -> (i32, i32) {
    %c0_i32 = arith.constant 0 : i32
    %c0_i32_0 = arith.constant 0 : i32
    return %arg0, %c0_i32 : i32, i32
  }
}

</mosaic_0001>

<bundles_post_ra>
// kernel: tpu_custom_call.1
= control target key start
LH: loop header
LB: loop body
LE: loop exit
PB: predicated region body
PF: predicated region fallthrough
CT: control target
= control target key end

     0   :  { %s1211_s0 = inlined_call_operand.hbm [shape: f32[16,32], index: 0, kind: input, shape index: {}]   ;;  %s1212_s1 = inlined_call_operand.hbm [shape: bf16[32,256], index: 1, kind: input, shape index: {}]   ;;  %s1213_s2 = inlined_call_operand.hbm [shape: bf16[128,128], index: 2, kind: input, shape index: {}]   ;;  %s1214_s3 = inlined_call_operand.vmem [shape: f32[3,128], index: 3, kind: input, shape index: {}]   ;;  %s1215_s4 = inlined_call_operand.vmem [shape: f32[1,128], index: 4, kind: input, shape index: {}]   ;;  %s1216_s5 = inlined_call_operand.hbm [shape: f32[16,128], index: 5, kind: output, shape index: {}]  }
   0x1   :  { %1220 = sst [smem:[#allocation13_spill]] %s1212_s1 }
   0x2   :  { %10 = vsyncpa [#allocation4], 0 }
   0x3   :  { %12 = vsyncpa [#allocation4 + $0x1], 0 }
   0x4   :  { %13 = vsyncpa [#allocation7], 0 }
   0x5   :  { %14 = vsyncpa [#allocation5], 0 }
   0x6   :  { %16 = vsyncpa [#allocation5 + $0x1], 0  ;;  %s1009_s18 = smov 0   ;;  %s1011_s19 = smov 0  }
   0x7   :  { %s1013_s20 = smov 0   ;;  %s1015_s21 = smov 0  }
   0x8   :  { %s1017_s22 = smov 0   ;;  %s1019_s23 = smov 0  }
   0x9 LB: > { %s633_s24 = sadd.s32 4294967295, %s966_s23   ;;  %s634_s25 = sadd.s32 4294967294, %s966_s23   ;;  %s966_s23 = sphi %s1019_s23, %s22_s23   ;;  %s962_s22 = sphi %s1017_s22, %s1238_s22   ;;  %s958_s21 = sphi %s1015_s21, %s1237_s21   ;;  %s954_s20 = sphi %s1013_s20, %s1236_s20   ;;  %s950_s19 = sphi %s1011_s19, %s1235_s19   ;;  %s946_s18 = sphi %s1009_s18, %s1234_s18  }
   0xa   : > { %p56_p0 = scmp.ne.s32.totalorder %s950_s19, %s946_s18  ;;  %p1043_p1 = scmp.eq.s32.totalorder %s633_s24, 0 }
   0xb   : > { %p1047_p2 = scmp.eq.s32.totalorder %s633_s24, 1  ;;  %p170_p3 = scmp.eq.s32.totalorder %s634_s25, 1 }
   0xc   : > { %s1221_s26 = scalar_select %p1043_p1, 1, 0 }
   0xd   : > { %p1053_p4 = por %p1043_p1, %p56_p0  ;;  %p635_p5 = scmp.ge.s32.totalorder %s966_s23, 1 }
   0xe   : > { %p1058_p6 = por %p170_p3, %p56_p0  ;;  %p177_p7 = scmp.lt.s32.totalorder %s966_s23, 3 }
   0xf   : > { %s1223_s28 = scalar_select %p1053_p4, 1, 0 }
  0x10   : > { %s1224_s29 = scalar_select %p1058_p6, 1, 0 }
  0x11   : > { %p1063_p8 = pnand %p635_p5, %p177_p7  ;;  %s968_s6 = smov [#allocation6]  }
  0x12   : > { %s189_s7 = sshll.u32 %s968_s6, 4  ;;  %s969_s9 = smov [#allocation8]   ;;  %s190_s7 = int_to_ptr.vmem [resolvable:$true] %s189_s7 }
  0x13   : > { %p708_p9 = pneg %p1063_p8  ;;  %s202_s10 = sshll.u32 %s969_s9, 4  ;;  %s203_s10 = int_to_ptr.vmem [resolvable:$true] %s202_s10 }
  0x14   : > { %s813_s11 = scalar_lea.vmem %s190_s7, 512  ;;  %p821_p5 = scmp.lt.s32.totalorder %s190_s7, %s190_s7 }
  0x15   : > { %p1072_p11 = pnand %p708_p9, %p1043_p1  ;;  %p814_p13 = scmp.ne.s32.totalorder %s190_s7, %s813_s11 }
  0x16   : > { %p822_p7 = scmp.lt.s32.totalorder %s813_s11, %s813_s11 }
  0x17   : > { %p804_p12 = pneg %p1072_p11 }
  0x18   : > { %p823_p10 = por %p822_p7, %p821_p5 }
  0x19   : > { %p816_p0 = pnand %p814_p13, %p804_p12 }
  0x1b   : > { %p817_p3 = pneg %p816_p0 }
  0x1d   : > { %p824_p9 = pnand %p823_p10, %p817_p3 }
  0x1f   : > { %827 = shalt.err (!%p824_p9)
}
  0x20   : > { %s970_s12 = smov 128   ;;  %s971_s13 = smov 8  }
  0x21   : > { %s1227_s1 = sld [smem:[#allocation13_spill]]  ;;  %s839_s16 = scalar_lea.vmem %s203_s10, 1024 }
  0x22   : > { %p840_p6 = scmp.ne.s32.totalorder %s203_s10, %s839_s16  ;;  %p847_p1 = scmp.lt.s32.totalorder %s203_s10, %s203_s10 }
  0x23   : > { %p848_p4 = scmp.lt.s32.totalorder %s839_s16, %s839_s16 }
  0x24   : > { %p842_p13 = pnand %p840_p6, %p804_p12 }
  0x25   : > { %p849_p5 = por %p848_p4, %p847_p1 }
  0x26   : > { %p843_p0 = pneg %p842_p13 }
  0x27   : > { %711 = dma.hbm_to_vmem [thread:$0]  (!%p1072_p11), %s1227_s1, 512, %s190_s7, [#allocation7], %s970_s12, %s970_s12, %s971_s13  }
  0x28   : > { %p850_p10 = pnand %p849_p5, %p843_p0 }
  0x2a   : > { %853 = shalt.err (!%p850_p10)
}
  0x2b   : > { %s972_s17 = smov 64   ;;  %s973_s24 = smov 4  }
  0x2c   : > { %714 = dma.hbm_to_vmem [thread:$0]  (!%p1072_p11), %s1213_s2, 1024, %s203_s10, [#allocation7], %s972_s17, %s972_s17, %s973_s24  }
  0x2d   : > { %s34_s7 = sadd.s32 1, %s962_s22  ;;  %s43_s9 = sadd.s32 1, %s954_s20 }
  0x2e   : > { %p36_p1 = scmp.ge.s32.totalorder %s34_s7, 2  ;;  %p50_p4 = scmp.ne.s32.totalorder %s954_s20, %s950_s19 }
  0x2f   : > { %p51_p6 = scmp.eq.s32.totalorder %s966_s23, 0  ;;  %p725_p12 = scmp.lt.s32.totalorder %s966_s23, 2 }
  0x30   : > { %s1240_s7 = smov (%p36_p1, %s34_s7), 0  ;;  %p1104_p7 = por %p1047_p2, %p50_p4 }
  0x31   : > { %p52_p3 = por %p51_p6, %p50_p4  ;;  %s38_s8 = ssub.s32 %s962_s22, %s1240_s7 }
  0x32   : > { %s222_s12 = sand.u32 1, %s954_s20   ;;  %p41_p9 = scmp.eq.s32.totalorder %s38_s8, 0 }
  0x33   : > { %s639_s10 = sshll.u32 %s222_s12, 3  ;;  %s640_s13 = sshll.u32 %s962_s22, 7 }
  0x34   : > { %s1113_s14 = scalar_select %p41_p9, %s954_s20, %s43_s9  }
  0x35   : > { %s232_s17 = scalar_lea.hbm %s1211_s0, %s640_s13  ;;  %s226_s24 = scalar_lea.vmem [#allocation3], %s639_s10 }
  0x36   : > { %s234_s25 = sshll.u32 %s226_s24, 4  ;;  %p1120_p11 = pnand %p725_p12, %p52_p3  ;;  %s235_s25 = int_to_ptr.vmem [resolvable:$true] %s234_s25 }
  0x37   : > { %s223_s6 = scalar_lea.sflag [#allocation4], %s222_s12  ;;  %s867_s8 = scalar_lea.vmem %s235_s25, 128 }
  0x38   : > { %p856_p2 = pneg %p1120_p11  ;;  %p868_p13 = scmp.ne.s32.totalorder %s235_s25, %s867_s8 }
  0x39   : > { %s974_s9 = smov [#allocation3]  }
  0x3a   : > { %p870_p0 = pnand %p868_p13, %p856_p2  ;;  %s872_s1 = sshll.u32 %s974_s9, 4  ;;  %s873_s1 = int_to_ptr.vmem [resolvable:$false] %s872_s1 }
  0x3b   : > { %s874_s13 = scalar_lea.vmem %s873_s1, 256  ;;  %p875_p10 = scmp.lt.s32.totalorder %s235_s25, %s873_s1 }
  0x3c   : > { %p871_p5 = pneg %p870_p0  ;;  %p876_p1 = scmp.lt.s32.totalorder %s874_s13, %s867_s8 }
  0x3e   : > { %p877_p4 = por %p876_p1, %p875_p10 }
  0x40   : > { %p878_p6 = pnand %p877_p4, %p871_p5 }
  0x42   : > { %881 = shalt.err (!%p878_p6)
}
  0x43   : > { %718 = dma.hbm_to_vmem [thread:$0]  (!%p1120_p11), %s232_s17, 128, %s235_s25, %s223_s6  }
  0x44   : > { %243 = sbr.rel (%p1063_p8) target bundleno = 664 (0x298), region = 40  ;;  %s1131_s12 = sand.u32 (!%p1063_p8), 1, %s950_s19  }
  0x45   : > { %s642_s10 = sshll.u32 (!%p1063_p8), %s1131_s12, 3  ;;  %s246_s15 = scalar_lea.sflag (!%p1063_p8), [#allocation4], %s1131_s12 }
  0x46   : > { %s249_s1 = scalar_lea.vmem (!%p1063_p8), [#allocation3], %s642_s10  ;;  %p1230_p12 = scmp.ne.s32.totalorder (!%p1063_p8), %s1223_s28, 0 }
  0x49   : > { %933 = dma.done.wait (%p1230_p12), %s246_s15, 128  }
  0x4a   : > { %935 = vsyncadd (%p1230_p12), %s246_s15, 4294967168  ;;  %p1231_p3 = scmp.ne.s32.totalorder %s1221_s26, 0 }
  0x4c   : > { %937 = dma.done.wait (%p1231_p3), [#allocation7], 1536  }
  0x4d   : > { %939 = vsyncadd (%p1231_p3), [#allocation7], 4294965760  ;;  %v975_v0 = vmov 0   ;;  %v786_v1 = vld [vmem:[#allocation6 + $0x14] ss:$8 sps:$4 sm:$0xff]   ;;  %vm319_vm0 = vcmask 261120  }
  0x4e   : > { %355 = vmatprep.mubr.bf16.mxu0 %v975_v0  ;;  %v788_v2 = vld [vmem:[#allocation6 + $0x10] ss:$8 sps:$4 sm:$0xff]   ;;  %335 = vmatprep.subr.bf16.mxu0 %v786_v1  ;;  %v789_v3 = vld [vmem:[#allocation6 + $0x4] ss:$8 sps:$4 sm:$0xff]   ;;  %v791_v4 = vld [vmem:[#allocation6] ss:$8 sps:$4 sm:$0xff]  }
  0x4f   : > { %v291_v5 = vld [vmem:[%s249_s1] sm:$0xff]  ;;  %336 = vmatpush1.bf16.msra.mxu0 %v788_v2  ;;  %v976_v15 = vmov 0.0   ;;  %v794_v17 = vld [vmem:[#allocation8 + $0x28] sm:$0xff]   ;;  %v795_v18 = vld [vmem:[#allocation8 + $0x20] sm:$0xff]   ;;  %vm977_vm1 = vmmov 0   ;;  %s664_s6 = sshll.u32 %s958_s21, 7 }
  0x50   : > { %337 = vmatprep.subr.bf16.mxu0 %v789_v3  ;;  %v292_v6 = vpack.c.bf16 %v291_v5, %v291_v5  ;;  %v651_v7 = vld [vmem:[%s1214_s3] ss:$0 sm:$0xff]  ;;  %v792_v14 = vld [vmem:[#allocation8 + $0x38] sm:$0xff]   ;;  %676 = vmatprep.subr.bf16.mxu1 %v976_v15  ;;  %v798_v21 = vld [vmem:[#allocation8 + $0x8] sm:$0xff]   ;;  %s283_s8 = scalar_lea.vmem [#allocation9], %s642_s10  ;;  %s1163_s1 = scalar_lea.hbm %s1216_s5, %s664_s6 }
  0x51   : > { %677 = vmatpush3.bf16.msra.mxu1 %v792_v14  ;;  %v793_v16 = vld [vmem:[#allocation8 + $0x30] sm:$0xff]   ;;  %692 = vmatprep.mubr.msk.bf16.mxu1 %vm977_vm1, %v976_v15  ;;  %v796_v19 = vld [vmem:[#allocation8 + $0x18] sm:$0xff]   ;;  %v799_v22 = vld [vmem:[#allocation8] sm:$0xff]   ;;  %s535_s9 = sshll.u32 %s283_s8, 4  ;;  %s522_s21 = scalar_lea.sflag [#allocation5], %s1131_s12  ;;  %s1165_s9 = int_to_ptr.vmem [resolvable:$true] %s535_s9 }
  0x52   : > { %678 = vmatprep.subr.bf16.mxu1 %v976_v15  ;;  %v797_v20 = vld [vmem:[#allocation8 + $0x10] sm:$0xff]   ;;  %s882_s28 = scalar_lea.vmem %s1165_s9, 128  ;;  %s978_s10 = smov [#allocation9]  }
  0x53   : > { %338 = vmatpush1.bf16.msra.mxu0 %v791_v4  ;;  %v652_v32 = vld [vmem:[%s1214_s3 + $0x1] ss:$0 sm:$0xff]  ;;  %v653_v35 = vld [vmem:[%s1214_s3 + $0x2] ss:$0 sm:$0xff]  ;;  %v662_v41 = vld [vmem:[%s1215_s4] ss:$0 sm:$0xff]  ;;  %p883_p8 = scmp.ne.s32.totalorder %s1165_s9, %s882_s28 }
  0x54   : > { %s886_s30 = sshll.u32 %s978_s10, 4  ;;  %s887_s30 = int_to_ptr.vmem [resolvable:$false] %s886_s30 }
  0x55   : > { %679 = vmatpush3.bf16.msra.mxu1 %v793_v16  ;;  %p884_p9 = pnand %p883_p8, %p1104_p7  ;;  %s888_s26 = scalar_lea.vmem %s887_s30, 256 }
  0x56   : > { %650 = vmatmul.mubr.msk.bf16.vlgmr.msra.gmra.mxu0 %vm319_vm0, %v292_v6  ;;  %680 = vmatprep.subr.bf16.mxu1 %v976_v15  ;;  %p889_p2 = scmp.lt.s32.totalorder %s1165_s9, %s887_s30  ;;  %p890_p13 = scmp.lt.s32.totalorder %s888_s26, %s882_s28 }
  0x57   : > { %p885_p11 = pneg %p884_p9 }
  0x58   : > { %p891_p0 = por %p890_p13, %p889_p2 }
  0x59   : > { %681 = vmatpush3.bf16.msra.mxu1 %v794_v17 }
  0x5a   : > { %682 = vmatprep.subr.bf16.mxu1 %v976_v15  ;;  %p892_p5 = pnand %p891_p0, %p885_p11 }
  0x5d   : > { %683 = vmatpush3.bf16.msra.mxu1 %v795_v18 }
  0x5e   : > { %684 = vmatprep.subr.bf16.mxu1 %v976_v15 }
  0x61   : > { %685 = vmatpush3.bf16.msra.mxu1 %v796_v19 }
  0x62   : > { %686 = vmatprep.subr.bf16.mxu1 %v976_v15 }
  0x65   : > { %687 = vmatpush3.bf16.msra.mxu1 %v797_v20 }
  0x66   : > { %688 = vmatprep.subr.bf16.mxu1 %v976_v15 }
  0x69   : > { %689 = vmatpush3.bf16.msra.mxu1 %v798_v21 }
  0x6a   : > { %690 = vmatprep.subr.bf16.mxu1 %v976_v15 }
  0x6d   : > { %691 = vmatpush3.bf16.msra.mxu1 %v799_v22 }
 0x116   : > { %v357_v8 = vpop.f32.mrf.mxu0 }
 0x117   : > { %v380_v9 = vadd.f32 %v651_v7, %v357_v8 }
 0x118   : > { %v359_v10 = vpop.f32.mrf.mxu0 }
 0x119   : > { %381 = vadd.xlane.f32.xlu0 %v380_v9  ;;  %v383_v12 = vmul.f32 %v380_v9, %v380_v9 }
 0x11a   : > { %v361_v11 = vpop.f32.mrf.mxu0 }
 0x11c   : > { %v362_v13 = vpop.f32.mrf.mxu0 }
 0x11d   : > { %384 = vadd.xlane.f32.xlu0 %v383_v12 }
 0x1a2   : > { %v382_v23 = vpop.xlane.xlu0 %381 }
 0x1a3   : > { %v386_v24 = vmul.f32 0.015625, %v382_v23 }
 0x1a5   : > { %v388_v26 = vmul.f32 %v386_v24, %v386_v24  ;;  %v393_v31 = vsub.f32 %v380_v9, %v386_v24 }
 0x1a6   : > { %v385_v25 = vpop.xlane.xlu0 %384 }
 0x1a7   : > { %v387_v27 = vmul.f32 0.015625, %v385_v25  ;;  %v398_v33 = vmul.f32 %v652_v32, %v393_v31 }
 0x1a9   : > { %v389_v28 = vsub.f32 %v387_v27, %v388_v26 }
 0x1ab   : > { %v390_v29 = vmax.f32 %v389_v28, 0.0 }
 0x1ad   : > { %v391_v30 = vadd.f32 1e-05, %v390_v29 }
 0x1af   : > { %800 = vrsqrt.f32 %v391_v30 }
 0x1bc   : > { %v801_v34 = vpop.eup %800 }
 0x1bd   : > { %v399_v36 = vmul.f32 %v801_v34, %v398_v33 }
 0x1bf   : > { %v404_v37 = vadd.f32 %v653_v35, %v399_v36 }
 0x1c1   : > { %v405_v38 = vmax.f32 %v404_v37, 0.0 }
 0x1c3   : > { %v406_v39 = vpack.c.bf16 %v405_v38, %v405_v38 }
 0x1c5   : > { %693 = vmatmul.mubr.bf16.vlgmr.msra.gmra.mxu1 %v406_v39 }
 0x285   : > { %v505_v40 = vpop.f32.mrf.mxu1 }
 0x286   : > { %v511_v42 = vadd.f32 %v505_v40, %v359_v10 }
 0x287   : > { %v694_v43 = vpop.f32.mrf.mxu1 }
 0x288   : > { %v519_v44 = vadd.f32 %v662_v41, %v511_v42 }
 0x289   : > { %v508_v45 = vpop.f32.mrf.mxu1 }
 0x28a   : > { %520 = vst [vmem:[%s283_s8] sm:$0xff] %v519_v44 }
 0x28b   : > { %v695_v46 = vpop.f32.mrf.mxu1 }
 0x28c   : > { %895 = shalt.err (!%p892_p5)
}
 0x28d   : > { %s896_s16 = scalar_lea.hbm %s1163_s1, 128  ;;  %s900_s24 = scalar_lea.hbm %s1216_s5, 256 }
 0x28e   : > { %p897_p10 = scmp.ne.s32.totalorder %s1163_s1, %s896_s16  ;;  %p901_p6 = scmp.lt.s32.totalorder %s1163_s1, %s1216_s5 }
 0x28f   : > { %p902_p12 = scmp.lt.s32.totalorder %s900_s24, %s896_s16 }
 0x290   : > { %p898_p1 = pnand %p897_p10, %p1104_p7 }
 0x291   : > { %p903_p3 = por %p902_p12, %p901_p6 }
 0x292   : > { %p899_p4 = pneg %p898_p1 }
 0x294   : > { %p904_p8 = pnand %p903_p3, %p899_p4 }
 0x296   : > { %907 = shalt.err (!%p904_p8)
}
 0x297   : > { %706 = dma.vmem_to_hbm [thread:$0]  (%p1104_p7), %s1165_s9, 128, %s1163_s1, %s522_s21  }
 0x298 PF: > { %s547_s6 = sand.u32 1, %s946_s18   ;;  %p1232_p9 = scmp.ne.s32.totalorder %s1224_s29, 0 }
 0x299   : > { %p1233_p11 = scmp.ge.s32.totalorder %s966_s23, 2  ;;  %s548_s8 = scalar_lea.sflag [#allocation5], %s547_s6 }
 0x29b   : > { %p720_p2 = pnand %p1233_p11, %p1232_p9 }
 0x29d   : > { %p721_p13 = pneg %p720_p2 }
 0x29f   : > { %941 = dma.done.wait (%p721_p13), %s548_s8, 128  }
 0x2a0   : > { %943 = vsyncadd (%p721_p13), %s548_s8, 4294967168  ;;  %s22_s23 = sadd.s32 1, %s966_s23   ;;  %s1234_s18 = smov %s950_s19 }
 0x2a1   : > { %p19_p0 = scmp.ge.s32.totalorder %s22_s23, 4   ;;  %s1235_s19 = smov %s954_s20 }
 0x2a2   : > { %s1236_s20 = smov %s1113_s14  ;;  %s1237_s21 = smov %s962_s22 }
 0x2a3   : > { %s1238_s22 = smov %s1240_s7  ;;  %21 = sbr.rel (!%p19_p0) target bundleno = 9 (0x9), region = 101 }
 0x2a8   :  { %553 = vsyncpa [#allocation4], 1 }
 0x2a9   :  { %555 = vsyncpa [#allocation4 + $0x1], 1 }
 0x2aa   :  { %556 = vsyncpa [#allocation7], 1 }
 0x2ab   :  { %557 = vsyncpa [#allocation5], 1 }
 0x2ac   :  { %559 = vsyncpa [#allocation5 + $0x1], 1 }

</bundles_post_ra>
